<compile_context>
chip_gen: v7x
topology: tpu7x:2x2x1
jax: 0.10.0
libtpu: 0.0.40
codegen_flags: <defaults>
</compile_context>

<pallas_src>
import jax
import jax.numpy as jnp
from jax.experimental import pallas as pl
from jax.experimental.pallas import tpu as pltpu


def policy_kernel(x_ref, w1_ref, b1_ref, w2_ref, b2_ref, out_ref):
    # x_ref : (S, TB)   batch tile, batch on lanes
    # w1_ref: (H, S)    fc1 weight (PyTorch-native), VMEM-resident
    # b1_ref: (H, 1)
    # w2_ref: (A, H)    fc3 weight, VMEM-resident
    # b2_ref: (A, 1)
    # out_ref: (A, TB)  softmax probabilities for this batch tile
    S = x_ref.shape[0]
    w1 = w1_ref[...]                                       # (H, S), tiny

    # fc1 on the VPU: K = S = 2 broadcast FMAs (skip the MXU entirely).
    h = b1_ref[...] + w1[:, 0:1] * x_ref[0:1, :]           # (H, TB)
    for k in range(1, S):                                  # unrolled, S is static
        h = h + w1[:, k:k + 1] * x_ref[k:k + 1, :]
    h = jnp.maximum(h, 0.0)                                # ReLU

    # fc3: (A, H) @ (H, TB) — one small MXU matmul, f32 accumulation.
    logits = jnp.dot(w2_ref[...], h, preferred_element_type=jnp.float32)
    logits = logits + b2_ref[...]                          # (A, TB)

    # Numerically stable softmax over the action axis (sublane axis here,
    # == dim=1 of the original (B, A) layout).
    m = jnp.max(logits, axis=0, keepdims=True)
    e = jnp.exp(logits - m)
    denom = jnp.sum(e, axis=0, keepdims=True)
    # Exact reciprocal keeps the 1e-5 reference tolerance; on v6e/v7x
    # approx=True would move it fully onto the otherwise-idle EUP slot.
    out_ref[...] = (e * pl.reciprocal(denom, approx=False)).astype(out_ref.dtype)


def _round_up(n, m):
    return ((n + m - 1) // m) * m


def policy_forward(x, w1, b1, w2, b2, *, block_b=1024):
    """x: (B, state_space) f32; w1: (H, S); b1: (H,); w2: (A, H); b2: (A,).

    Returns (B, action_space) f32 softmax probabilities
    (== softmax(relu(x @ w1.T + b1) @ w2.T + b2, axis=1)).
    """
    B, S = x.shape
    H = w1.shape[0]
    A = w2.shape[0]

    # Lane-dense layout: batch on the lane axis, padded to a multiple of the tile.
    tb = min(block_b, _round_up(max(B, 1), 128))           # batch tile (multiple of 128)
    bp = _round_up(B, tb)                                  # padded batch
    xt = jnp.pad(x.T, ((0, 0), (0, bp - B)))               # (S, bp)
    b1c = b1.reshape(H, 1)
    b2c = b2.reshape(A, 1)

    grid = (bp // tb,)
    cost = pl.CostEstimate(
        flops=2 * bp * (S * H + H * A),
        transcendentals=bp * A,
        bytes_accessed=4 * (bp * (S + A) + H * S + H + A * H + A),
    )

    out_t = pl.pallas_call(
        policy_kernel,
        out_shape=jax.ShapeDtypeStruct((A, bp), jnp.float32),
        grid_spec=pltpu.PrefetchScalarGridSpec(
            num_scalar_prefetch=0,
            grid=grid,
            in_specs=[
                pl.BlockSpec((S, tb), lambda i: (0, i)),    # x tile (pipelined)
                pl.BlockSpec((H, S), lambda i: (0, 0)),     # w1: resident (constant index)
                pl.BlockSpec((H, 1), lambda i: (0, 0)),     # b1
                pl.BlockSpec((A, H), lambda i: (0, 0)),     # w2
                pl.BlockSpec((A, 1), lambda i: (0, 0)),     # b2
            ],
            out_specs=pl.BlockSpec((A, tb), lambda i: (0, i)),
        ),
        compiler_params=pltpu.CompilerParams(
            dimension_semantics=("parallel",),              # megacore split on v7x
        ),
        cost_estimate=cost,
    )(xt, w1, b1c, w2, b2c)

    return out_t[:, :B].T                                   # back to (B, A)


def init_params(key, state_space=2, hidden=20, action_space=3):
    # Deterministic synthetic init, PyTorch-Linear-like uniform bounds,
    # PyTorch-native (out_features, in_features) weight shapes.
    k1, k2, k3, k4 = jax.random.split(key, 4)
    bound1 = 1.0 / (state_space ** 0.5)
    bound2 = 1.0 / (hidden ** 0.5)
    w1 = jax.random.uniform(k1, (hidden, state_space), jnp.float32, -bound1, bound1)
    b1 = jax.random.uniform(k2, (hidden,), jnp.float32, -bound1, bound1)
    w2 = jax.random.uniform(k3, (action_space, hidden), jnp.float32, -bound2, bound2)
    b2 = jax.random.uniform(k4, (action_space,), jnp.float32, -bound2, bound2)
    return w1, b1, w2, b2


if __name__ == "__main__":
    key = jax.random.PRNGKey(0)
    kx, kp = jax.random.split(key)

    batch = 8           # tiny RL-style batch; kernel pads/tiles batch internally
    state_space = 2     # MountainCar observation dim
    action_space = 3    # MountainCar action count
    hidden = 20

    x = jax.random.normal(kx, (batch, state_space), jnp.float32)
    w1, b1, w2, b2 = init_params(kp, state_space, hidden, action_space)

    probs = policy_forward(x, w1, b1, w2, b2)
    probs = jax.block_until_ready(probs)

    # Sanity check against plain-JAX reference of the PyTorch forward.
    h_ref = jnp.maximum(x @ w1.T + b1, 0.0)
    ref = jax.nn.softmax(h_ref @ w2.T + b2, axis=1)
    assert probs.shape == (batch, action_space)
    assert jnp.allclose(probs, ref, atol=1e-5, rtol=1e-5)
    assert jnp.allclose(jnp.sum(probs, axis=1), 1.0, atol=1e-5)

    print("KERNEL_OK")
</pallas_src>

<mosaic_0001>
module attributes {stable_mosaic.version = 11 : i64} {
  func.func @policy_kernel(%arg0: i32, %arg1: memref<2x128xf32, #tpu.memory_space<vmem>>, %arg2: memref<20x2xf32, #tpu.memory_space<vmem>>, %arg3: memref<20x1xf32, #tpu.memory_space<vmem>>, %arg4: memref<3x20xf32, #tpu.memory_space<vmem>>, %arg5: memref<3x1xf32, #tpu.memory_space<vmem>>, %arg6: memref<3x128xf32, #tpu.memory_space<vmem>>) attributes {dimension_semantics = [#tpu.dimension_semantics<parallel>], iteration_bounds = array<i64: 1>, scalar_prefetch = 0 : i64, scratch_operands = 0 : i64, tpu.core_type = #tpu.core_type<tc>, window_params = [{transform_indices = @transform_0, window_bounds = array<i64: 2, 128>}, {pipeline_mode = #tpu.pipeline_mode<synchronous>, transform_indices = @transform_1, window_bounds = array<i64: 20, 2>}, {pipeline_mode = #tpu.pipeline_mode<synchronous>, transform_indices = @transform_2, window_bounds = array<i64: 20, 1>}, {pipeline_mode = #tpu.pipeline_mode<synchronous>, transform_indices = @transform_3, window_bounds = array<i64: 3, 20>}, {pipeline_mode = #tpu.pipeline_mode<synchronous>, transform_indices = @transform_4, window_bounds = array<i64: 3, 1>}, {transform_indices = @transform_5, window_bounds = array<i64: 3, 128>}]} {
    %c0 = arith.constant 0 : index
    %c0_0 = arith.constant 0 : index
    %0 = vector.load %arg2[%c0, %c0_0] : memref<20x2xf32, #tpu.memory_space<vmem>>, vector<20x2xf32>
    %c0_1 = arith.constant 0 : index
    %c0_2 = arith.constant 0 : index
    %1 = vector.load %arg3[%c0_1, %c0_2] : memref<20x1xf32, #tpu.memory_space<vmem>>, vector<20x1xf32>
    %2 = vector.extract_strided_slice %0 {offsets = [0, 0], sizes = [20, 1], strides = [1, 1]} : vector<20x2xf32> to vector<20x1xf32>
    %c0_3 = arith.constant 0 : index
    %c0_4 = arith.constant 0 : index
    %3 = vector.load %arg1[%c0_3, %c0_4] : memref<2x128xf32, #tpu.memory_space<vmem>>, vector<1x128xf32>
    %4 = vector.broadcast %2 : vector<20x1xf32> to vector<20x128xf32>
    %5 = vector.broadcast %3 : vector<1x128xf32> to vector<20x128xf32>
    %6 = arith.mulf %4, %5 : vector<20x128xf32>
    %7 = vector.broadcast %1 : vector<20x1xf32> to vector<20x128xf32>
    %8 = arith.addf %7, %6 : vector<20x128xf32>
    %9 = vector.extract_strided_slice %0 {offsets = [0, 1], sizes = [20, 1], strides = [1, 1]} : vector<20x2xf32> to vector<20x1xf32>
    %c1 = arith.constant 1 : index
    %c0_5 = arith.constant 0 : index
    %10 = vector.load %arg1[%c1, %c0_5] : memref<2x128xf32, #tpu.memory_space<vmem>>, vector<1x128xf32>
    %11 = vector.broadcast %9 : vector<20x1xf32> to vector<20x128xf32>
    %12 = vector.broadcast %10 : vector<1x128xf32> to vector<20x128xf32>
    %13 = arith.mulf %11, %12 : vector<20x128xf32>
    %14 = arith.addf %8, %13 : vector<20x128xf32>
    %cst = arith.constant 0.000000e+00 : f32
    %15 = vector.broadcast %cst : f32 to vector<20x128xf32>
    %16 = arith.maximumf %14, %15 : vector<20x128xf32>
    %c0_6 = arith.constant 0 : index
    %c0_7 = arith.constant 0 : index
    %17 = vector.load %arg4[%c0_6, %c0_7] : memref<3x20xf32, #tpu.memory_space<vmem>>, vector<3x20xf32>
    %cst_8 = arith.constant dense<0.000000e+00> : vector<3x128xf32>
    %18 = tpu.matmul %17, %16, %cst_8 {dimension_numbers = #tpu.dot_dimension_numbers<[1], [0], [0], [1], [0, 0, 1, 1], [], []>} : vector<3x20xf32>, vector<20x128xf32>, vector<3x128xf32> -> vector<3x128xf32>
    %c0_9 = arith.constant 0 : index
    %c0_10 = arith.constant 0 : index
    %19 = vector.load %arg5[%c0_9, %c0_10] : memref<3x1xf32, #tpu.memory_space<vmem>>, vector<3x1xf32>
    %20 = vector.broadcast %19 : vector<3x1xf32> to vector<3x128xf32>
    %21 = arith.addf %18, %20 : vector<3x128xf32>
    %cst_11 = arith.constant dense<0xFF800000> : vector<128xf32>
    %22 = vector.multi_reduction <maximumf>, %21, %cst_11 [0] : vector<3x128xf32> to vector<128xf32>
    %23 = vector.shape_cast %22 : vector<128xf32> to vector<1x128xf32>
    %24 = vector.broadcast %23 : vector<1x128xf32> to vector<3x128xf32>
    %25 = arith.subf %21, %24 : vector<3x128xf32>
    %26 = math.exp %25 : vector<3x128xf32>
    %cst_12 = arith.constant dense<0.000000e+00> : vector<128xf32>
    %27 = vector.multi_reduction <add>, %26, %cst_12 [0] : vector<3x128xf32> to vector<128xf32>
    %28 = vector.shape_cast %27 : vector<128xf32> to vector<1x128xf32>
    %29 = tpu.reciprocal %28 : vector<1x128xf32> -> vector<1x128xf32>
    %30 = vector.broadcast %29 : vector<1x128xf32> to vector<3x128xf32>
    %31 = arith.mulf %26, %30 : vector<3x128xf32>
    %c0_13 = arith.constant 0 : index
    %c0_14 = arith.constant 0 : index
    %32 = vector.load %arg6[%c0_13, %c0_14] : memref<3x128xf32, #tpu.memory_space<vmem>>, vector<3x128xf32>
    tpu.vector_store %arg6[%c0_13, %c0_14], %31 {strides = array<i32>} : memref<3x128xf32, #tpu.memory_space<vmem>>, vector<3x128xf32>,
    return
  }
  func.func @transform_0(%arg0: i32) -> (i32, i32) {
    %c0_i32 = arith.constant 0 : i32
    %c0_i32_0 = arith.constant 0 : i32
    return %c0_i32, %arg0 : i32, i32
  }
  func.func @transform_1(%arg0: i32) -> (i32, i32) {
    %c0_i32 = arith.constant 0 : i32
    %c0_i32_0 = arith.constant 0 : i32
    %c0_i32_1 = arith.constant 0 : i32
    return %c0_i32, %c0_i32_0 : i32, i32
  }
  func.func @transform_2(%arg0: i32) -> (i32, i32) {
    %c0_i32 = arith.constant 0 : i32
    %c0_i32_0 = arith.constant 0 : i32
    %c0_i32_1 = arith.constant 0 : i32
    return %c0_i32, %c0_i32_0 : i32, i32
  }
  func.func @transform_3(%arg0: i32) -> (i32, i32) {
    %c0_i32 = arith.constant 0 : i32
    %c0_i32_0 = arith.constant 0 : i32
    %c0_i32_1 = arith.constant 0 : i32
    return %c0_i32, %c0_i32_0 : i32, i32
  }
  func.func @transform_4(%arg0: i32) -> (i32, i32) {
    %c0_i32 = arith.constant 0 : i32
    %c0_i32_0 = arith.constant 0 : i32
    %c0_i32_1 = arith.constant 0 : i32
    return %c0_i32, %c0_i32_0 : i32, i32
  }
  func.func @transform_5(%arg0: i32) -> (i32, i32) {
    %c0_i32 = arith.constant 0 : i32
    %c0_i32_0 = arith.constant 0 : i32
    return %c0_i32, %arg0 : i32, i32
  }
}

</mosaic_0001>

<bundles_post_ra>
// kernel: tpu_custom_call.1
= control target key start
LH: loop header
LB: loop body
LE: loop exit
PB: predicated region body
PF: predicated region fallthrough
CT: control target
= control target key end

     0   :  { %v276_v2 = vmov 0   ;;  %s354_s0 = inlined_call_operand.vmem [shape: f32[2,128], index: 0, kind: input, shape index: {}]   ;;  %s355_s1 = inlined_call_operand.vmem [shape: f32[20,2], index: 1, kind: input, shape index: {}]   ;;  %s356_s2 = inlined_call_operand.vmem [shape: f32[20,1], index: 2, kind: input, shape index: {}]   ;;  %s357_s3 = inlined_call_operand.vmem [shape: f32[3,20], index: 3, kind: input, shape index: {}]   ;;  %s358_s4 = inlined_call_operand.vmem [shape: f32[3,1], index: 4, kind: input, shape index: {}]   ;;  %s359_s5 = inlined_call_operand.hbm [shape: f32[3,128], index: 5, kind: output, shape index: {}]  }
   0x1   :  { %v24_v0 = vld [vmem:[%s356_s2] sm:$0xff]  ;;  %241 = vset.pattern.permute.xlu1 %v276_v2  ;;  %240 = vset.pattern.permute.xlu0 %v276_v2 }
   0x2   :  { %v21_v1 = vld [vmem:[%s355_s1] sm:$0xff]  ;;  %52 = vperm.xlu1 %241, %v24_v0  }
   0x3   :  { %30 = vperm.xlu0 %240, %v21_v1  }
   0x4   :  { %10 = vsyncpa [#allocation3], 0  ;;  %v25_v3 = vld [vmem:[%s356_s2 + $0x8] sm:$0xff]  ;;  %v277_v5 = vmov 1   ;;  %v23_v6 = vld [vmem:[%s355_s1 + $0x10] sm:$0xf] }
   0x5   :  { %v22_v4 = vld [vmem:[%s355_s1 + $0x8] sm:$0xff]  ;;  %v26_v7 = vld [vmem:[%s356_s2 + $0x10] sm:$0xf]  ;;  %v278_v8 = vmov 0.0|0.0   ;;  %vm279_vm0 = vmmov 0   ;;  %v280_v9 = vmov 0.0  }
   0x6   :  { %57 = vperm.xlu1 %241, %v25_v3   ;;  %231 = vmatprep.subr.bf16.mxu0 %v278_v8  ;;  %v95_v10 = vld [vmem:[%s358_s4] sm:$0x7]  ;;  %vm105_vm1 = vcmask 1043456   ;;  %vm101_vm2 = vcmask 162816   ;;  %vm179_vm3 = vcmask 1042432  }
   0x7   :  { %35 = vperm.xlu0 %240, %v22_v4   ;;  %228 = vmatprep.mubr.msk.f32.mxu0 %vm279_vm0, %v280_v9  ;;  %v214_v13 = vld [vmem:[%s354_s0] ss:$0 sm:$0xff]  ;;  %v215_v18 = vld [vmem:[%s354_s0 + $0x1] ss:$0 sm:$0xff] }
   0x8   :  { %v94_v38 = vld [vmem:[%s357_s3] sm:$0x7]  ;;  %s281_s3 = smov [#allocation2]  }
   0x9   :  { %s206_s9 = sshll.u32 %s281_s3, 4  ;;  %s207_s9 = int_to_ptr.vmem [resolvable:$true] %s206_s9 }
   0xa   :  { %243 = vset.pattern.permute.xlu1 %v277_v5  ;;  %s252_s10 = scalar_lea.vmem %s207_s9, 64  ;;  %p257_p1 = scmp.lt.s32.totalorder %s207_s9, %s207_s9 }
   0xb   :  { %242 = vset.pattern.permute.xlu0 %v277_v5  ;;  %74 = vperm.xlu1 %243, %v22_v4   ;;  %p253_p0 = scmp.ne.s32.totalorder %s207_s9, %s252_s10  ;;  %p258_p2 = scmp.lt.s32.totalorder %s252_s10, %s252_s10 }
   0xc   :  { %70 = vperm.xlu0 %242, %v21_v1  }
   0xd   :  { %p259_p3 = por %p258_p2, %p257_p1 }
   0xf   :  { %244 = vset.pattern.permute.xlu1 %v276_v2  ;;  %p260_p4 = pnand %p259_p3, %p253_p0 }
  0x10   :  { %245 = vset.pattern.permute.xlu0 %v276_v2  ;;  %40 = vperm.xlu1 %244, %v23_v6  }
  0x11   :  { %62 = vperm.xlu0 %245, %v26_v7  }
  0x14   :  { %246 = vset.pattern.permute.xlu1 %v277_v5 }
  0x15   :  { %78 = vperm.xlu1 %246, %v23_v6  }
  0x19   :  { %247 = vset.pattern.permute.xlu1 %v276_v2 }
  0x1a   :  { %98 = vperm.xlu1 %247, %v95_v10  }
  0x81   :  { %v53_v11 = vpop.permute.xlu1 %52 }
  0x82   :  { %v31_v12 = vpop.permute.xlu0 %30 }
  0x83   :  { %v47_v16 = vmul.f32 %v214_v13, %v31_v12 }
  0x85   :  { %v58_v14 = vpop.permute.xlu1 %57  ;;  %v65_v21 = vadd.f32 %v53_v11, %v47_v16 }
  0x86   :  { %v36_v15 = vpop.permute.xlu0 %35 }
  0x87   :  { %v48_v17 = vmul.f32 %v214_v13, %v36_v15 }
  0x89   :  { %v66_v22 = vadd.f32 %v58_v14, %v48_v17 }
  0x8a   :  { %v75_v19 = vpop.permute.xlu1 %74 }
  0x8b   :  { %v71_v20 = vpop.permute.xlu0 %70  ;;  %v86_v23 = vmul.f32 %v215_v18, %v75_v19 }
  0x8c   :  { %v85_v24 = vmul.f32 %v215_v18, %v71_v20 }
  0x8d   :  { %v89_v25 = vadd.f32 %v86_v23, %v66_v22 }
  0x8e   :  { %v88_v26 = vadd.f32 %v85_v24, %v65_v21 }
  0x8f   :  { %v92_v27 = vmax.f32 %v89_v25, 0.0  ;;  %v41_v29 = vpop.permute.xlu1 %40 }
  0x90   :  { %v91_v28 = vmax.f32 %v88_v26, 0.0  ;;  %v49_v30 = vmul.f32 %v214_v13, %v41_v29  ;;  %v63_v32 = vpop.permute.xlu0 %62 }
  0x92   :  { %v232_v31 = vpack.c.bf16 %v92_v27, %v91_v28  ;;  %v67_v34 = vadd.f32 %v63_v32, %v49_v30 }
  0x94   :  { %233 = vmatpush3.bf16.msra.mxu0 %v232_v31  ;;  %v79_v33 = vpop.permute.xlu1 %78 }
  0x95   :  { %226 = vmatprep.subr.mxu0 %v280_v9  ;;  %v87_v35 = vmul.f32 %v215_v18, %v79_v33 }
  0x97   :  { %v90_v36 = vadd.f32 %v87_v35, %v67_v34 }
  0x99   :  { %v93_v37 = vmax.f32 %v90_v36, 0.0  ;;  %v99_v39 = vpop.permute.xlu1 %98 }
  0x9b   :  { %227 = vmatpush3.msk.msra.mxu0 %vm105_vm1, %v93_v37 }
  0x9c   :  { %229 = vmatmul.mubr.msk.f32.vlgmr.msra.gmra.mrb[0].mxu0 %vm101_vm2, %v94_v38 }
 0x16f   :  { %v175_v40 = vpop.f32.mrb[0].mxu0 }
 0x170   :  { %v176_v41 = vadd.f32 %v175_v40, %v99_v39  ;;  %v230_v42 = vpop.f32.mrb[1].mxu0 }
 0x172   :  { %v180_v43 = vsel %vm179_vm3, %v176_v41, -inf }
 0x173   :  { %v181_v44 = vrot.slane %v180_v43, 4 }
 0x175   :  { %v182_v45 = vmax.f32 %v180_v43, %v181_v44 }
 0x177   :  { %v183_v46 = vrot.slane %v182_v45, 2 }
 0x179   :  { %v184_v47 = vmax.f32 %v182_v45, %v183_v46 }
 0x17b   :  { %v185_v48 = vrot.slane %v184_v47, 1 }
 0x17d   :  { %v186_v49 = vmax.f32 %v184_v47, %v185_v48 }
 0x17f   :  { %v187_v50 = vsub.f32 %v176_v41, %v186_v49 }
 0x181   :  { %v188_v51 = vmul.f32 1.442695, %v187_v50 }
 0x183   :  { %248 = vpow2.f32 %v188_v51 }
 0x18d   :  { %v249_v52 = vpop.eup %248 }
 0x18e   :  { %v190_v53 = vsel %vm179_vm3, %v249_v52, 0.0 }
 0x18f   :  { %v191_v54 = vrot.slane %v190_v53, 4 }
 0x191   :  { %v192_v55 = vadd.f32 %v191_v54, %v190_v53 }
 0x193   :  { %v193_v56 = vrot.slane %v192_v55, 2 }
 0x195   :  { %v194_v57 = vadd.f32 %v193_v56, %v192_v55 }
 0x197   :  { %v195_v58 = vrot.slane %v194_v57, 1 }
 0x199   :  { %v196_v59 = vadd.f32 %v195_v58, %v194_v57 }
 0x19b   :  { %250 = vrcp.f32 %v196_v59 }
 0x1a5   :  { %v251_v60 = vpop.eup %250 }
 0x1a6   :  { %v198_v61 = vmul.f32 %v251_v60, %v249_v52 }
 0x1a8   :  { %199 = vst [vmem:[#allocation2] sm:$0x7] %v198_v61 }
 0x1a9   :  { %263 = shalt.err (!%p260_p4)
}
 0x1aa   :  { %s264_s13 = scalar_lea.hbm %s359_s5, 64 }
 0x1ab   :  { %p265_p5 = scmp.ne.s32.totalorder %s359_s5, %s264_s13  ;;  %p268_p6 = scmp.lt.u32.totalorder %s264_s13, %s359_s5 }
 0x1ad   :  { %p270_p7 = pnand %p268_p6, %p265_p5 }
 0x1af   :  { %273 = shalt.err (!%p270_p7)
}
 0x1b0   :  { %209 = dma.vmem_to_hbm [thread:$0]  %s207_s9, 64, %s359_s5, [#allocation3]  }
 0x1b1   :  { %274 = dma.done.wait [#allocation3], 64  }
 0x1b2   :  { %275 = vsyncadd [#allocation3], 4294967232 }
 0x1b3   :  { %213 = vsyncpa [#allocation3], 1 }

</bundles_post_ra>
